<compile_context>
chip_gen: v7x
topology: tpu7x:2x2x1
jax: 0.10.0
libtpu: 0.0.40
codegen_flags: <defaults>
</compile_context>

<pallas_src>
import functools

import jax
import jax.numpy as jnp
from jax.experimental import pallas as pl
from jax.experimental.pallas import tpu as pltpu

_LANE = 128
_NEG_BIG = -1e30  # padded-expert bias (f32) -> exp() underflows to exactly 0


def _gate_kernel(x_ref, w_ref, b_ref, o_ref):
    # x_ref: [TM, D]  w_ref: [D, Ep]  b_ref: [1, Ep] (f32)  o_ref: [TM, E]
    e = o_ref.shape[-1]
    logits = jnp.dot(
        x_ref[...], w_ref[...], preferred_element_type=jnp.float32
    ) + b_ref[...]
    # numerically-stable softmax over the last dim (== F.softmax(dim=-1));
    # padded lanes have -1e30 bias so they contribute exp() == 0.
    m = jnp.max(logits, axis=-1, keepdims=True)
    ex = jnp.exp(logits - m)
    denom = jnp.sum(ex, axis=-1, keepdims=True)
    # Exact divide: VPU/EUP have huge slack in this DMA-bound kernel, and
    # rows then sum to 1 within f32 rounding.
    probs = ex / denom
    # Store only the real E expert columns (lane slice; masked vst is tiny
    # compared to the x DMA).
    o_ref[...] = probs[:, :e].astype(o_ref.dtype)


def _vmem_budget_and_cap():
    """Generation-aware (tile budget, vmem_limit cap) in bytes."""
    try:
        cap_bytes = int(pltpu.get_tpu_info().vmem_capacity_bytes)
    except Exception:
        cap_bytes = 64 << 20  # conservative default (v7x per-TensorCore)
    if cap_bytes >= (128 << 20):          # v5e / v6e: 128 MiB physical VMEM
        return 80 << 20, 100 << 20
    return 40 << 20, 48 << 20             # v7x: leave Mosaic scratch headroom


def _pick_block_m(m, d, e_pad, e_out, x_bytes, out_bytes, w_bytes, budget):
    """Largest row tile that fits the generation-aware VMEM budget."""
    sub_min = 16 if x_bytes == 2 else 8          # bf16 packs 16 sublanes
    fixed = d * e_pad * w_bytes + e_pad * 4      # single-buffered weight + bias
    per_row = (2 * d * x_bytes                   # double-buffered x tile
               + 2 * e_out * out_bytes           # double-buffered out tile
               + 3 * e_pad * 4)                  # f32 logits / exp intermediates
    bm = max(sub_min, (budget - fixed) // per_row)
    # Bytes-based cap: allow up to 8192 rows so small-D gates still get
    # multi-MiB x tiles (per-grid-step overhead stays hidden).
    bm = min(bm, 8192)
    if bm >= 256:
        bm = (bm // 256) * 256
    else:
        bm = max(sub_min, (bm // sub_min) * sub_min)
    # never tile larger than the (sublane-rounded) problem size
    m_r = ((m + sub_min - 1) // sub_min) * sub_min
    bm = min(bm, max(sub_min, m_r))
    bm = max(sub_min, (bm // sub_min) * sub_min)
    return int(bm)


def prepare_gate_params(weight, bias):
    """One-time lane-dense padding of nn.Linear params.

    weight: [E, D] (PyTorch layout), bias: [E].
    Returns (w_pad [D, e_pad], b_pad [1, e_pad] f32, E). Call this once at
    parameter-load time; do NOT redo it per forward call.
    """
    e, d = weight.shape
    e_pad = max(_LANE, ((e + _LANE - 1) // _LANE) * _LANE)
    w_pad = jnp.zeros((d, e_pad), weight.dtype).at[:, :e].set(weight.T)
    b_pad = jnp.full((1, e_pad), _NEG_BIG, jnp.float32)
    b_pad = b_pad.at[0, :e].set(bias.astype(jnp.float32))
    return w_pad, b_pad, int(e)


@functools.partial(jax.jit, static_argnames=("num_experts", "block_m"))
def gate_forward(x, w_pad, b_pad, num_experts, block_m=None):
    """softmax(x @ W.T + b, axis=-1) with pre-padded params.

    x:      [..., D]
    w_pad:  [D, e_pad]   (from prepare_gate_params)
    b_pad:  [1, e_pad]   f32
    """
    *lead, d = x.shape
    e = num_experts
    e_pad = w_pad.shape[1]
    m = 1
    for s in lead:
        m *= s
    x2 = x.reshape(m, d)

    x_bytes = x.dtype.itemsize
    out_bytes = x.dtype.itemsize
    w_bytes = w_pad.dtype.itemsize

    budget, limit_cap = _vmem_budget_and_cap()
    if block_m is None:
        block_m = _pick_block_m(m, d, e_pad, e, x_bytes, out_bytes, w_bytes,
                                budget)

    # Ragged last block handled by Pallas (no jnp.pad copy of x); padded rows
    # are masked on output writeback.
    grid_m = pl.cdiv(m, block_m)

    vmem_bytes = (2 * block_m * d * x_bytes              # x double-buffer
                  + d * e_pad * w_bytes + e_pad * 4      # weight+bias (1 buf)
                  + 2 * block_m * e * out_bytes          # out double-buffer
                  + 3 * block_m * e_pad * 4)             # f32 intermediates
    vmem_limit = int(min(max(vmem_bytes + (8 << 20), 32 << 20), limit_cap))

    # Grid-invariant weight/bias: single-buffer them; Pallas skips re-DMA for
    # constant index_maps, so the second buffer would be pure VMEM waste.
    try:
        w_spec = pl.BlockSpec((d, e_pad), lambda i: (0, 0),
                              pipeline_mode=pl.Buffered(1))
        b_spec = pl.BlockSpec((1, e_pad), lambda i: (0, 0),
                              pipeline_mode=pl.Buffered(1))
    except Exception:  # older jax without pipeline_mode -> default buffering
        w_spec = pl.BlockSpec((d, e_pad), lambda i: (0, 0))
        b_spec = pl.BlockSpec((1, e_pad), lambda i: (0, 0))

    # TODO(synk): on v7x, verify the single "parallel" axis shards across both
    # TensorCores; if not, switch to pltpu.CORE_PARALLEL (each TC then holds
    # its own weight copy inside the per-TC 64 MiB budget).
    out = pl.pallas_call(
        _gate_kernel,
        out_shape=jax.ShapeDtypeStruct((m, e), x.dtype),
        grid_spec=pltpu.PrefetchScalarGridSpec(
            num_scalar_prefetch=0,
            grid=(grid_m,),
            in_specs=[
                pl.BlockSpec((block_m, d), lambda i: (i, 0)),   # x row tile
                w_spec,                                          # resident weight
                b_spec,                                          # bias row (f32)
            ],
            out_specs=pl.BlockSpec((block_m, e), lambda i: (i, 0)),
        ),
        compiler_params=pltpu.CompilerParams(
            dimension_semantics=("parallel",),
            vmem_limit_bytes=vmem_limit,
        ),
    )(x2, w_pad, b_pad)

    return out.reshape(*lead, e)


if __name__ == "__main__":
    # small shapes consistent with Gate(input_dim, num_experts)
    batch, seq, input_dim, num_experts = 2, 8, 32, 4

    key = jax.random.PRNGKey(0)
    kx, kw, kb = jax.random.split(key, 3)

    x = jax.random.normal(kx, (batch, seq, input_dim), dtype=jnp.float32)

    # deterministic synthetic params (nn.Linear: weight [E, D], bias [E])
    bound = 1.0 / jnp.sqrt(jnp.float32(input_dim))
    weight = jax.random.uniform(
        kw, (num_experts, input_dim), minval=-bound, maxval=bound,
        dtype=jnp.float32)
    bias = jax.random.uniform(
        kb, (num_experts,), minval=-bound, maxval=bound, dtype=jnp.float32)

    # one-time param padding (hoisted out of the per-call path)
    w_pad, b_pad, e = prepare_gate_params(weight, bias)

    y = gate_forward(x, w_pad, b_pad, num_experts=e)
    y = jax.block_until_ready(y)

    # reference in full precision (default einsum precision on TPU is bf16)
    ref = jax.nn.softmax(
        jnp.einsum("bsd,ed->bse", x, weight,
                   precision=jax.lax.Precision.HIGHEST) + bias,
        axis=-1)

    assert y.shape == (batch, seq, num_experts)
    assert jnp.allclose(y, ref, atol=2e-3, rtol=2e-3)
    # exact divide -> rows sum to 1 within f32 rounding
    assert jnp.allclose(jnp.sum(y, axis=-1), 1.0, atol=1e-4)

    print("KERNEL_OK")
</pallas_src>

<mosaic_0001>
module attributes {stable_mosaic.version = 11 : i64} {
  func.func @_gate_kernel(%arg0: i32, %arg1: memref<16x32xf32, #tpu.memory_space<vmem>>, %arg2: memref<32x128xf32, #tpu.memory_space<vmem>>, %arg3: memref<1x128xf32, #tpu.memory_space<vmem>>, %arg4: memref<16x4xf32, #tpu.memory_space<vmem>>) attributes {dimension_semantics = [#tpu.dimension_semantics<parallel>], iteration_bounds = array<i64: 1>, scalar_prefetch = 0 : i64, scratch_operands = 0 : i64, tpu.core_type = #tpu.core_type<tc>, window_params = [{transform_indices = @transform_0, window_bounds = array<i64: 16, 32>}, {pipeline_mode = #tpu.pipeline_mode<synchronous>, transform_indices = @transform_1, window_bounds = array<i64: 32, 128>}, {pipeline_mode = #tpu.pipeline_mode<synchronous>, transform_indices = @transform_2, window_bounds = array<i64: 1, 128>}, {transform_indices = @transform_3, window_bounds = array<i64: 16, 4>}]} {
    %c0 = arith.constant 0 : index
    %c0_0 = arith.constant 0 : index
    %0 = vector.load %arg1[%c0, %c0_0] : memref<16x32xf32, #tpu.memory_space<vmem>>, vector<16x32xf32>
    %c0_1 = arith.constant 0 : index
    %c0_2 = arith.constant 0 : index
    %1 = vector.load %arg2[%c0_1, %c0_2] : memref<32x128xf32, #tpu.memory_space<vmem>>, vector<32x128xf32>
    %cst = arith.constant dense<0.000000e+00> : vector<16x128xf32>
    %2 = tpu.matmul %0, %1, %cst {dimension_numbers = #tpu.dot_dimension_numbers<[1], [0], [0], [1], [0, 0, 1, 1], [], []>} : vector<16x32xf32>, vector<32x128xf32>, vector<16x128xf32> -> vector<16x128xf32>
    %c0_3 = arith.constant 0 : index
    %c0_4 = arith.constant 0 : index
    %3 = vector.load %arg3[%c0_3, %c0_4] : memref<1x128xf32, #tpu.memory_space<vmem>>, vector<1x128xf32>
    %4 = vector.broadcast %3 : vector<1x128xf32> to vector<16x128xf32>
    %5 = arith.addf %2, %4 : vector<16x128xf32>
    %cst_5 = arith.constant dense<0xFF800000> : vector<16xf32>
    %6 = vector.multi_reduction <maximumf>, %5, %cst_5 [1] : vector<16x128xf32> to vector<16xf32>
    %7 = vector.shape_cast %6 : vector<16xf32> to vector<16x1xf32>
    %8 = vector.broadcast %7 : vector<16x1xf32> to vector<16x128xf32>
    %9 = arith.subf %5, %8 : vector<16x128xf32>
    %10 = math.exp %9 : vector<16x128xf32>
    %cst_6 = arith.constant dense<0.000000e+00> : vector<16xf32>
    %11 = vector.multi_reduction <add>, %10, %cst_6 [1] : vector<16x128xf32> to vector<16xf32>
    %12 = vector.shape_cast %11 : vector<16xf32> to vector<16x1xf32>
    %13 = vector.broadcast %12 : vector<16x1xf32> to vector<16x128xf32>
    %14 = arith.divf %10, %13 : vector<16x128xf32>
    %15 = vector.extract_strided_slice %14 {offsets = [0, 0], sizes = [16, 4], strides = [1, 1]} : vector<16x128xf32> to vector<16x4xf32>
    %c0_7 = arith.constant 0 : index
    %c0_8 = arith.constant 0 : index
    %16 = vector.load %arg4[%c0_7, %c0_8] : memref<16x4xf32, #tpu.memory_space<vmem>>, vector<16x4xf32>
    tpu.vector_store %arg4[%c0_7, %c0_8], %15 {strides = array<i32>} : memref<16x4xf32, #tpu.memory_space<vmem>>, vector<16x4xf32>,
    return
  }
  func.func @transform_0(%arg0: i32) -> (i32, i32) {
    %c0_i32 = arith.constant 0 : i32
    %c0_i32_0 = arith.constant 0 : i32
    return %arg0, %c0_i32 : i32, i32
  }
  func.func @transform_1(%arg0: i32) -> (i32, i32) {
    %c0_i32 = arith.constant 0 : i32
    %c0_i32_0 = arith.constant 0 : i32
    %c0_i32_1 = arith.constant 0 : i32
    return %c0_i32, %c0_i32_0 : i32, i32
  }
  func.func @transform_2(%arg0: i32) -> (i32, i32) {
    %c0_i32 = arith.constant 0 : i32
    %c0_i32_0 = arith.constant 0 : i32
    %c0_i32_1 = arith.constant 0 : i32
    return %c0_i32, %c0_i32_0 : i32, i32
  }
  func.func @transform_3(%arg0: i32) -> (i32, i32) {
    %c0_i32 = arith.constant 0 : i32
    %c0_i32_0 = arith.constant 0 : i32
    return %arg0, %c0_i32 : i32, i32
  }
}

</mosaic_0001>

<bundles_post_ra>
// kernel: gate_forward.1
= control target key start
LH: loop header
LB: loop body
LE: loop exit
PB: predicated region body
PF: predicated region fallthrough
CT: control target
= control target key end

     0   :  { %8 = vsyncpa [#allocation3], 0  ;;  %s309_s0 = inlined_call_operand.hbm [shape: f32[16,32], index: 0, kind: input, shape index: {}]   ;;  %s310_s1 = inlined_call_operand.hbm [shape: f32[32,128], index: 1, kind: input, shape index: {}]   ;;  %s311_s2 = inlined_call_operand.vmem [shape: f32[1,128], index: 2, kind: input, shape index: {}]   ;;  %s312_s3 = inlined_call_operand.vmem [shape: f32[16,4], index: 3, kind: output, shape index: {}]  }
   0x1   :  { %9 = vsyncpa [#allocation5], 0  ;;  %s252_s12 = smov [#allocation2]   ;;  %s204_s16 = scalar_lea.hbm %s309_s0, 256 }
   0x2   :  { %s15_s13 = sshll.u32 %s252_s12, 4  ;;  %p205_p0 = scmp.ne.s32.totalorder %s309_s0, %s204_s16  ;;  %s16_s13 = int_to_ptr.vmem [resolvable:$true] %s15_s13 }
   0x3   :  { %p208_p1 = scmp.lt.u32.totalorder %s204_s16, %s309_s0 }
   0x5   :  { %p210_p2 = pnand %p208_p1, %p205_p0 }
   0x7   :  { %213 = shalt.err (!%p210_p2)
}
   0x8   :  { %s214_s21 = scalar_lea.vmem %s16_s13, 256  ;;  %p219_p4 = scmp.lt.s32.totalorder %s16_s13, %s16_s13 }
   0x9   :  { %p215_p3 = scmp.ne.s32.totalorder %s16_s13, %s214_s21  ;;  %p220_p5 = scmp.lt.s32.totalorder %s214_s21, %s214_s21 }
   0xb   :  { %p221_p6 = por %p220_p5, %p219_p4 }
   0xd   :  { %p222_p7 = pnand %p221_p6, %p215_p3 }
   0xf   :  { %225 = shalt.err (!%p222_p7)
}
  0x10   :  { %s253_s22 = smov 128   ;;  %s254_s23 = smov 8  }
  0x11   :  { %21 = dma.hbm_to_vmem [thread:$0]  %s309_s0, 256, %s16_s13, [#allocation3], %s253_s22, %s253_s22, %s254_s23  }
  0x12   :  { %s255_s26 = smov [#allocation4]   ;;  %s226_s30 = scalar_lea.hbm %s310_s1, 512 }
  0x13   :  { %s27_s27 = sshll.u32 %s255_s26, 4  ;;  %p227_p8 = scmp.ne.s32.totalorder %s310_s1, %s226_s30  ;;  %s28_s27 = int_to_ptr.vmem [resolvable:$true] %s27_s27 }
  0x14   :  { %p230_p9 = scmp.lt.u32.totalorder %s226_s30, %s310_s1 }
  0x16   :  { %p232_p10 = pnand %p230_p9, %p227_p8 }
  0x18   :  { %235 = shalt.err (!%p232_p10)
}
  0x19   :  { %s236_s8 = scalar_lea.vmem %s28_s27, 512  ;;  %p241_p12 = scmp.lt.s32.totalorder %s28_s27, %s28_s27 }
  0x1a   :  { %p237_p11 = scmp.ne.s32.totalorder %s28_s27, %s236_s8  ;;  %p242_p13 = scmp.lt.s32.totalorder %s236_s8, %s236_s8 }
  0x1c   :  { %p243_p0 = por %p242_p13, %p241_p12 }
  0x1e   :  { %p244_p1 = pnand %p243_p0, %p237_p11 }
  0x20   :  { %247 = shalt.err (!%p244_p1)
}
  0x21   :  { %33 = dma.hbm_to_vmem [thread:$0]  %s310_s1, 512, %s28_s27, [#allocation5], %s253_s22, %s253_s22, %s254_s23  }
  0x22   :  { %248 = dma.done.wait [#allocation3], 256  }
  0x23   :  { %249 = vsyncadd [#allocation3], 4294967040 }
  0x24   :  { %250 = dma.done.wait [#allocation5], 512  }
  0x25   :  { %251 = vsyncadd [#allocation5], 4294966784  ;;  %vm55_vm0 = vcmask 261120   ;;  %v44_v0 = vld [vmem:[#allocation4] sm:$0xff]  ;;  %v45_v1 = vld [vmem:[#allocation4 + $0x8] sm:$0xff]  ;;  %vm155_vm1 = vcmask 31744  }
  0x26   :  { %v46_v2 = vld [vmem:[#allocation4 + $0x10] sm:$0xff]  ;;  %v184_v3 = vpack.c.bf16 %v45_v1, %v44_v0  ;;  %v47_v4 = vld [vmem:[#allocation4 + $0x18] sm:$0xff] }
  0x27   :  { %v42_v5 = vld [vmem:[#allocation2] sm:$0xff]  ;;  %v188_v6 = vpack.c.bf16 %v47_v4, %v46_v2  ;;  %v43_v7 = vld [vmem:[#allocation2 + $0x8] sm:$0xff] }
  0x28   :  { %181 = vmatprep.mubr.msk.f32.mxu0 %vm55_vm0, %v42_v5  ;;  %185 = vmatprep.subr.bf16.mxu0 %v184_v3  ;;  %v164_v8 = vld [vmem:[%s311_s2] ss:$0 sm:$0xff] }
  0x29   :  { %187 = vmatpush3.bf16.msra.mxu0 %v184_v3 }
  0x2a   :  { %189 = vmatprep.subr.bf16.mxu0 %v188_v6 }
  0x2d   :  { %191 = vmatpush3.bf16.msra.mxu0 %v188_v6 }
  0x30   :  { %182 = vmatmul.mubr.msk.f32.vlgmr.msra.gmra.mrb[0].mxu0 %vm55_vm0, %v43_v7 }
 0x103   :  { %v183_v9 = vpop.f32.mrb[0].mxu0 }
 0x104   :  { %v128_v10 = vpop.f32.mrb[1].mxu0  ;;  %v134_v12 = vadd.f32 %v183_v9, %v164_v8 }
 0x105   :  { %v129_v11 = vadd.f32 %v164_v8, %v128_v10 }
 0x107   :  { %137 = vmax.xlane.f32.xlu0 %v129_v11 }
 0x10b   :  { %139 = vmax.xlane.f32.xlu0 %v134_v12 }
 0x194   :  { %v138_v13 = vpop.xlane.xlu0 %137 }
 0x195   :  { %v141_v14 = vsub.f32 %v129_v11, %v138_v13 }
 0x197   :  { %v143_v15 = vmul.f32 1.442695, %v141_v14 }
 0x198   :  { %v140_v16 = vpop.xlane.xlu0 %139 }
 0x199   :  { %196 = vpow2.f32 %v143_v15  ;;  %v142_v17 = vsub.f32 %v134_v12, %v140_v16 }
 0x19b   :  { %v145_v18 = vmul.f32 1.442695, %v142_v17 }
 0x19d   :  { %198 = vpow2.f32 %v145_v18 }
 0x1a3   :  { %v197_v19 = vpop.eup %196 }
 0x1a4   :  { %147 = vadd.xlane.f32.xlu1 %v197_v19 }
 0x1a7   :  { %v199_v20 = vpop.eup %198 }
 0x1a8   :  { %149 = vadd.xlane.f32.xlu1 %v199_v20 }
 0x231   :  { %v148_v21 = vpop.xlane.xlu1 %147 }
 0x232   :  { %200 = vrcp.f32 %v148_v21 }
 0x235   :  { %v150_v22 = vpop.xlane.xlu1 %149 }
 0x236   :  { %202 = vrcp.f32 %v150_v22 }
 0x23c   :  { %v201_v23 = vpop.eup %200 }
 0x23d   :  { %v152_v24 = vmul.f32 %v201_v23, %v197_v19 }
 0x23f   :  { %156 = vst.msk [vmem:[%s312_s3] sm:$0xff] %vm155_vm1, %v152_v24 }
 0x240   :  { %v203_v25 = vpop.eup %202 }
 0x241   :  { %v154_v26 = vmul.f32 %v203_v25, %v199_v20 }
 0x243   :  { %157 = vst.msk [vmem:[%s312_s3 + $0x8] sm:$0xff] %vm155_vm1, %v154_v26 }
 0x244   :  { %162 = vsyncpa [#allocation3], 1 }
 0x245   :  { %163 = vsyncpa [#allocation5], 1 }

</bundles_post_ra>
